<compile_context>
chip_gen: v7x
topology: tpu7x:2x2x1
jax: 0.10.0
libtpu: 0.0.40
codegen_flags: <defaults>
</compile_context>

<pallas_src>
import jax
import jax.numpy as jnp
from jax.experimental import pallas as pl
from jax.experimental.pallas import tpu as pltpu

MAX_TILE_M = 2048   # upper bound on batch rows per grid step


def _round_up(n, m):
    return ((n + m - 1) // m) * m


def _choose_tile_m(batch, max_tile_m=MAX_TILE_M):
    """Pick the batch tile.

    Big enough to amortize the ~0.35 us per-grid-step overhead (mem-bound tiles
    hit ~85% of HBM roofline at 512+ rows), small enough that large batches
    produce >= 2 grid steps so dimension_semantics=("parallel",) can shard the
    grid across both TensorCores on v7x.
    """
    b8 = _round_up(batch, 8)
    if b8 <= 256:
        return b8                               # single small tile, no padding blow-up
    tile = _round_up(pl.cdiv(b8, 2), 256)       # >= 2 steps for large batches
    return min(max_tile_m, tile)


def mlp_kernel(x_ref, w1_ref, b1_ref, w2_ref, b2_ref, w3_ref, b3_ref,
               w4t_ref, b4_ref, o_ref):
    # Activations enter the MXU as bf16 (native MXU dtype on v5e/v6e/v7x);
    # accumulation is f32 throughout.
    x = x_ref[...].astype(jnp.bfloat16)

    # fc1 + ReLU   (input_size -> 128)
    h = jnp.dot(x, w1_ref[...], preferred_element_type=jnp.float32) + b1_ref[...]
    h = jnp.maximum(h, 0.0).astype(jnp.bfloat16)   # max in f32 (v5e-safe), store bf16
    # dropout(p=0.3): identity in eval/inference mode (matches module.eval()).
    # TODO(synk): training-mode dropout (pltpu.prng_random_bits mask) not emitted here.

    # fc2 + ReLU   (128 -> 64)
    h = jnp.dot(h, w2_ref[...], preferred_element_type=jnp.float32) + b2_ref[...]
    h = jnp.maximum(h, 0.0).astype(jnp.bfloat16)

    # fc3 + ReLU   (64 -> 32)
    h = jnp.dot(h, w3_ref[...], preferred_element_type=jnp.float32) + b3_ref[...]
    h = jnp.maximum(h, 0.0)                        # stays f32: feeds the f32 VPU output path

    # output layer (32 -> 1): an N=1 matmul would waste the MXU; broadcast-multiply
    # against the weight row on the VPU + lane reduction on the XLU instead.
    logits = jnp.sum(h * w4t_ref[...], axis=-1, keepdims=True) + b4_ref[...]

    # Narrow store: one f32 per row (4 B/row HBM writeback instead of 512 B).
    o_ref[...] = jax.nn.sigmoid(logits)


def neural_network_forward(x, params, max_tile_m=MAX_TILE_M):
    """x: (B, input_size), f32 or bf16. params: dict (fc1..3 weights bf16, rest f32)."""
    B, F = x.shape
    tile_m = _choose_tile_m(B, max_tile_m)
    num_tiles = pl.cdiv(B, tile_m)
    b_pad = num_tiles * tile_m
    if b_pad != B:
        x = jnp.pad(x, ((0, b_pad - B), (0, 0)))

    # Final layer weight as a (1, 32) row for the VPU path (kept f32).
    w4t = params["w4"].T

    args = (x,
            params["w1"], params["b1"],
            params["w2"], params["b2"],
            params["w3"], params["b3"],
            w4t, params["b4"])

    def resident_spec(a):
        # Constant block index: weight/bias DMA'd once, stays VMEM-resident across grid steps.
        nd = a.ndim
        return pl.BlockSpec(a.shape, lambda i, _nd=nd: (0,) * _nd)

    in_specs = [pl.BlockSpec((tile_m, F), lambda i: (i, 0))] + \
               [resident_spec(a) for a in args[1:]]

    out = pl.pallas_call(
        mlp_kernel,
        out_shape=jax.ShapeDtypeStruct((b_pad, 1), jnp.float32),
        grid=(num_tiles,),
        in_specs=in_specs,
        out_specs=pl.BlockSpec((tile_m, 1), lambda i: (i, 0)),
        compiler_params=pltpu.CompilerParams(
            dimension_semantics=("parallel",)),
    )(*args)

    # Padded rows (B..b_pad) hold sigmoid of the bias chain; slice them off here.
    return out[:B]


def init_params(key, input_size):
    """Deterministic init mimicking torch.nn.Linear default (U[-1/sqrt(fan_in), 1/sqrt(fan_in)]).

    fc1..fc3 weights stored bf16 (native MXU dtype, halves weight DMA); biases and the
    1-wide output weight stay f32 (they feed the f32 VPU path).
    """
    dims = [(input_size, 128), (128, 64), (64, 32), (32, 1)]
    params = {}
    for i, (fan_in, fan_out) in enumerate(dims, start=1):
        key, kw, kb = jax.random.split(key, 3)
        bound = 1.0 / jnp.sqrt(jnp.float32(fan_in))
        w = jax.random.uniform(kw, (fan_in, fan_out), jnp.float32, -bound, bound)
        b = jax.random.uniform(kb, (1, fan_out), jnp.float32, -bound, bound)
        params[f"w{i}"] = w if fan_out == 1 else w.astype(jnp.bfloat16)
        params[f"b{i}"] = b
    return params


def _reference_forward(x, params):
    """Pure-JAX reference using the same (bf16) weights, f32 accumulation."""
    h = jnp.maximum(jnp.dot(x.astype(jnp.bfloat16), params["w1"],
                            preferred_element_type=jnp.float32) + params["b1"], 0.0)
    h = jnp.maximum(jnp.dot(h.astype(jnp.bfloat16), params["w2"],
                            preferred_element_type=jnp.float32) + params["b2"], 0.0)
    h = jnp.maximum(jnp.dot(h.astype(jnp.bfloat16), params["w3"],
                            preferred_element_type=jnp.float32) + params["b3"], 0.0)
    logits = jnp.dot(h, params["w4"]) + params["b4"]
    return jax.nn.sigmoid(logits)


if __name__ == "__main__":
    input_size = 32
    batch = 8

    key = jax.random.PRNGKey(0)
    key, kx = jax.random.split(key)
    x = jax.random.normal(kx, (batch, input_size), jnp.float32)
    params = init_params(key, input_size)

    out = neural_network_forward(x, params)
    out = jax.block_until_ready(out)

    # sanity: shape (B, 1), values in (0, 1) from sigmoid, matches pure-JAX reference
    assert out.shape == (batch, 1)
    assert bool(jnp.all((out > 0.0) & (out < 1.0)))
    ref = _reference_forward(x, params)
    assert bool(jnp.allclose(out, ref, atol=5e-2)), "mismatch vs JAX reference"

    print("KERNEL_OK")
</pallas_src>

<mosaic_0001>
module attributes {stable_mosaic.version = 11 : i64} {
  func.func @mlp_kernel(%arg0: i32, %arg1: memref<8x32xf32, #tpu.memory_space<vmem>>, %arg2: memref<32x128xbf16, #tpu.memory_space<vmem>>, %arg3: memref<1x128xf32, #tpu.memory_space<vmem>>, %arg4: memref<128x64xbf16, #tpu.memory_space<vmem>>, %arg5: memref<1x64xf32, #tpu.memory_space<vmem>>, %arg6: memref<64x32xbf16, #tpu.memory_space<vmem>>, %arg7: memref<1x32xf32, #tpu.memory_space<vmem>>, %arg8: memref<1x32xf32, #tpu.memory_space<vmem>>, %arg9: memref<1x1xf32, #tpu.memory_space<vmem>>, %arg10: memref<8x1xf32, #tpu.memory_space<vmem>>) attributes {dimension_semantics = [#tpu.dimension_semantics<parallel>], iteration_bounds = array<i64: 1>, scalar_prefetch = 0 : i64, scratch_operands = 0 : i64, tpu.core_type = #tpu.core_type<tc>, window_params = [{transform_indices = @transform_0, window_bounds = array<i64: 8, 32>}, {pipeline_mode = #tpu.pipeline_mode<synchronous>, transform_indices = @transform_1, window_bounds = array<i64: 32, 128>}, {pipeline_mode = #tpu.pipeline_mode<synchronous>, transform_indices = @transform_2, window_bounds = array<i64: 1, 128>}, {pipeline_mode = #tpu.pipeline_mode<synchronous>, transform_indices = @transform_3, window_bounds = array<i64: 128, 64>}, {pipeline_mode = #tpu.pipeline_mode<synchronous>, transform_indices = @transform_4, window_bounds = array<i64: 1, 64>}, {pipeline_mode = #tpu.pipeline_mode<synchronous>, transform_indices = @transform_5, window_bounds = array<i64: 64, 32>}, {pipeline_mode = #tpu.pipeline_mode<synchronous>, transform_indices = @transform_6, window_bounds = array<i64: 1, 32>}, {pipeline_mode = #tpu.pipeline_mode<synchronous>, transform_indices = @transform_7, window_bounds = array<i64: 1, 32>}, {pipeline_mode = #tpu.pipeline_mode<synchronous>, transform_indices = @transform_8, window_bounds = array<i64: 1, 1>}, {transform_indices = @transform_9, window_bounds = array<i64: 8, 1>}]} {
    %c0 = arith.constant 0 : index
    %c0_0 = arith.constant 0 : index
    %0 = vector.load %arg1[%c0, %c0_0] : memref<8x32xf32, #tpu.memory_space<vmem>>, vector<8x32xf32>
    %1 = arith.truncf %0 : vector<8x32xf32> to vector<8x32xbf16>
    %c0_1 = arith.constant 0 : index
    %c0_2 = arith.constant 0 : index
    %2 = vector.load %arg2[%c0_1, %c0_2] : memref<32x128xbf16, #tpu.memory_space<vmem>>, vector<32x128xbf16>
    %cst = arith.constant dense<0.000000e+00> : vector<8x128xf32>
    %3 = tpu.matmul %1, %2, %cst {dimension_numbers = #tpu.dot_dimension_numbers<[1], [0], [0], [1], [0, 0, 1, 1], [], []>} : vector<8x32xbf16>, vector<32x128xbf16>, vector<8x128xf32> -> vector<8x128xf32>
    %c0_3 = arith.constant 0 : index
    %c0_4 = arith.constant 0 : index
    %4 = vector.load %arg3[%c0_3, %c0_4] : memref<1x128xf32, #tpu.memory_space<vmem>>, vector<1x128xf32>
    %5 = vector.broadcast %4 : vector<1x128xf32> to vector<8x128xf32>
    %6 = arith.addf %3, %5 : vector<8x128xf32>
    %cst_5 = arith.constant 0.000000e+00 : f32
    %7 = vector.broadcast %cst_5 : f32 to vector<8x128xf32>
    %8 = arith.maximumf %6, %7 : vector<8x128xf32>
    %9 = arith.truncf %8 : vector<8x128xf32> to vector<8x128xbf16>
    %c0_6 = arith.constant 0 : index
    %c0_7 = arith.constant 0 : index
    %10 = vector.load %arg4[%c0_6, %c0_7] : memref<128x64xbf16, #tpu.memory_space<vmem>>, vector<128x64xbf16>
    %cst_8 = arith.constant dense<0.000000e+00> : vector<8x64xf32>
    %11 = tpu.matmul %9, %10, %cst_8 {dimension_numbers = #tpu.dot_dimension_numbers<[1], [0], [0], [1], [0, 0, 1, 1], [], []>} : vector<8x128xbf16>, vector<128x64xbf16>, vector<8x64xf32> -> vector<8x64xf32>
    %c0_9 = arith.constant 0 : index
    %c0_10 = arith.constant 0 : index
    %12 = vector.load %arg5[%c0_9, %c0_10] : memref<1x64xf32, #tpu.memory_space<vmem>>, vector<1x64xf32>
    %13 = vector.broadcast %12 : vector<1x64xf32> to vector<8x64xf32>
    %14 = arith.addf %11, %13 : vector<8x64xf32>
    %cst_11 = arith.constant 0.000000e+00 : f32
    %15 = vector.broadcast %cst_11 : f32 to vector<8x64xf32>
    %16 = arith.maximumf %14, %15 : vector<8x64xf32>
    %17 = arith.truncf %16 : vector<8x64xf32> to vector<8x64xbf16>
    %c0_12 = arith.constant 0 : index
    %c0_13 = arith.constant 0 : index
    %18 = vector.load %arg6[%c0_12, %c0_13] : memref<64x32xbf16, #tpu.memory_space<vmem>>, vector<64x32xbf16>
    %cst_14 = arith.constant dense<0.000000e+00> : vector<8x32xf32>
    %19 = tpu.matmul %17, %18, %cst_14 {dimension_numbers = #tpu.dot_dimension_numbers<[1], [0], [0], [1], [0, 0, 1, 1], [], []>} : vector<8x64xbf16>, vector<64x32xbf16>, vector<8x32xf32> -> vector<8x32xf32>
    %c0_15 = arith.constant 0 : index
    %c0_16 = arith.constant 0 : index
    %20 = vector.load %arg7[%c0_15, %c0_16] : memref<1x32xf32, #tpu.memory_space<vmem>>, vector<1x32xf32>
    %21 = vector.broadcast %20 : vector<1x32xf32> to vector<8x32xf32>
    %22 = arith.addf %19, %21 : vector<8x32xf32>
    %cst_17 = arith.constant 0.000000e+00 : f32
    %23 = vector.broadcast %cst_17 : f32 to vector<8x32xf32>
    %24 = arith.maximumf %22, %23 : vector<8x32xf32>
    %c0_18 = arith.constant 0 : index
    %c0_19 = arith.constant 0 : index
    %25 = vector.load %arg8[%c0_18, %c0_19] : memref<1x32xf32, #tpu.memory_space<vmem>>, vector<1x32xf32>
    %26 = vector.broadcast %25 : vector<1x32xf32> to vector<8x32xf32>
    %27 = arith.mulf %24, %26 : vector<8x32xf32>
    %cst_20 = arith.constant dense<0.000000e+00> : vector<8xf32>
    %28 = vector.multi_reduction <add>, %27, %cst_20 [1] : vector<8x32xf32> to vector<8xf32>
    %29 = vector.shape_cast %28 : vector<8xf32> to vector<8x1xf32>
    %c0_21 = arith.constant 0 : index
    %c0_22 = arith.constant 0 : index
    %30 = vector.load %arg9[%c0_21, %c0_22] : memref<1x1xf32, #tpu.memory_space<vmem>>, vector<1x1xf32>
    %31 = vector.broadcast %30 : vector<1x1xf32> to vector<8x1xf32>
    %32 = arith.addf %29, %31 : vector<8x1xf32>
    %33 = arith.negf %32 : vector<8x1xf32>
    %34 = math.exp %33 : vector<8x1xf32>
    %cst_23 = arith.constant 1.000000e+00 : f32
    %35 = vector.broadcast %cst_23 : f32 to vector<8x1xf32>
    %36 = arith.addf %35, %34 : vector<8x1xf32>
    %37 = arith.divf %35, %36 : vector<8x1xf32>
    %c0_24 = arith.constant 0 : index
    %c0_25 = arith.constant 0 : index
    %38 = vector.load %arg10[%c0_24, %c0_25] : memref<8x1xf32, #tpu.memory_space<vmem>>, vector<8x1xf32>
    tpu.vector_store %arg10[%c0_24, %c0_25], %37 {strides = array<i32>} : memref<8x1xf32, #tpu.memory_space<vmem>>, vector<8x1xf32>,
    return
  }
  func.func @transform_0(%arg0: i32) -> (i32, i32) {
    %c0_i32 = arith.constant 0 : i32
    %c0_i32_0 = arith.constant 0 : i32
    return %arg0, %c0_i32 : i32, i32
  }
  func.func @transform_1(%arg0: i32) -> (i32, i32) {
    %c0_i32 = arith.constant 0 : i32
    %c0_i32_0 = arith.constant 0 : i32
    %c0_i32_1 = arith.constant 0 : i32
    return %c0_i32, %c0_i32_0 : i32, i32
  }
  func.func @transform_2(%arg0: i32) -> (i32, i32) {
    %c0_i32 = arith.constant 0 : i32
    %c0_i32_0 = arith.constant 0 : i32
    %c0_i32_1 = arith.constant 0 : i32
    return %c0_i32, %c0_i32_0 : i32, i32
  }
  func.func @transform_3(%arg0: i32) -> (i32, i32) {
    %c0_i32 = arith.constant 0 : i32
    %c0_i32_0 = arith.constant 0 : i32
    %c0_i32_1 = arith.constant 0 : i32
    return %c0_i32, %c0_i32_0 : i32, i32
  }
  func.func @transform_4(%arg0: i32) -> (i32, i32) {
    %c0_i32 = arith.constant 0 : i32
    %c0_i32_0 = arith.constant 0 : i32
    %c0_i32_1 = arith.constant 0 : i32
    return %c0_i32, %c0_i32_0 : i32, i32
  }
  func.func @transform_5(%arg0: i32) -> (i32, i32) {
    %c0_i32 = arith.constant 0 : i32
    %c0_i32_0 = arith.constant 0 : i32
    %c0_i32_1 = arith.constant 0 : i32
    return %c0_i32, %c0_i32_0 : i32, i32
  }
  func.func @transform_6(%arg0: i32) -> (i32, i32) {
    %c0_i32 = arith.constant 0 : i32
    %c0_i32_0 = arith.constant 0 : i32
    %c0_i32_1 = arith.constant 0 : i32
    return %c0_i32, %c0_i32_0 : i32, i32
  }
  func.func @transform_7(%arg0: i32) -> (i32, i32) {
    %c0_i32 = arith.constant 0 : i32
    %c0_i32_0 = arith.constant 0 : i32
    %c0_i32_1 = arith.constant 0 : i32
    return %c0_i32, %c0_i32_0 : i32, i32
  }
  func.func @transform_8(%arg0: i32) -> (i32, i32) {
    %c0_i32 = arith.constant 0 : i32
    %c0_i32_0 = arith.constant 0 : i32
    %c0_i32_1 = arith.constant 0 : i32
    return %c0_i32, %c0_i32_0 : i32, i32
  }
  func.func @transform_9(%arg0: i32) -> (i32, i32) {
    %c0_i32 = arith.constant 0 : i32
    %c0_i32_0 = arith.constant 0 : i32
    return %arg0, %c0_i32 : i32, i32
  }
}

</mosaic_0001>

<bundles_post_ra>
// kernel: tpu_custom_call.1
= control target key start
LH: loop header
LB: loop body
LE: loop exit
PB: predicated region body
PF: predicated region fallthrough
CT: control target
= control target key end

     0   :  { %v433_v0 = vmov 0.0   ;;  %vm434_vm0 = vmmov 0   ;;  %vm60_vm1 = vcmask 261120   ;;  %vm258_vm2 = vcmask 523264   ;;  %s553_s1 = inlined_call_operand.vmem [shape: bf16[32,128], index: 1, kind: input, shape index: {}]   ;;  %s554_s0 = inlined_call_operand.vmem [shape: f32[8,32], index: 0, kind: input, shape index: {}]   ;;  %s555_s3 = inlined_call_operand.vmem [shape: bf16[128,64], index: 3, kind: input, shape index: {}]   ;;  %s556_s5 = inlined_call_operand.vmem [shape: bf16[64,32], index: 5, kind: input, shape index: {}]   ;;  %s557_s2 = inlined_call_operand.vmem [shape: f32[1,128], index: 2, kind: input, shape index: {}]   ;;  %s558_s4 = inlined_call_operand.vmem [shape: f32[1,64], index: 4, kind: input, shape index: {}]   ;;  %s559_s8 = inlined_call_operand.<no memory space> [shape: f32[1,1], index: 8, kind: input, shape index: {}]   ;;  %s560_s6 = inlined_call_operand.vmem [shape: f32[1,32], index: 6, kind: input, shape index: {}]   ;;  %s561_s7 = inlined_call_operand.vmem [shape: f32[1,32], index: 7, kind: input, shape index: {}]   ;;  %s562_s9 = inlined_call_operand.vmem [shape: f32[8,1], index: 9, kind: output, shape index: {}]  }
   0x1   :  { %373 = vmatprep.subr.bf16.mxu0 %v433_v0  ;;  %v415_v1 = vld [vmem:[%s553_s1] sm:$0xff]   ;;  %377 = vmatprep.mubr.msk.bf16.mxu0 %vm434_vm0, %v433_v0  ;;  %v416_v2 = vld [vmem:[%s553_s1 + $0x8] sm:$0xff]   ;;  %v419_v7 = vld [vmem:[%s555_s3 + $0x10] sm:$0xff]   ;;  %v14_v33 = vstv %s559_s8  ;;  %vm328_vm3 = vcmask 7168  }
   0x2   :  { %381 = vmatprep.subr.bf16.mxu1 %v433_v0  ;;  %397 = vmatprep.mubr.msk.bf16.mxu1 %vm434_vm0, %v433_v0  ;;  %v35_v3 = vld [vmem:[%s554_s0] sm:$0xff]  ;;  %v418_v6 = vld [vmem:[%s555_s3 + $0x8] sm:$0xff]   ;;  %v420_v8 = vld [vmem:[%s555_s3 + $0x18] sm:$0xff]   ;;  %15 = vst [vmem:[#allocation2] sm:$0x1] %v14_v33 }
   0x3   :  { %374 = vmatpush3.bf16.msra.mxu0 %v415_v1  ;;  %v417_v4 = vld [vmem:[%s555_s3] sm:$0xff]   ;;  %v36_v5 = vpack.c.bf16 %v35_v3, %v35_v3  ;;  %v422_v10 = vld [vmem:[%s555_s3 + $0x28] sm:$0xff]   ;;  %v423_v11 = vld [vmem:[%s555_s3 + $0x30] sm:$0xff]  }
   0x4   :  { %375 = vmatprep.subr.bf16.mxu0 %v433_v0  ;;  %382 = vmatpush3.bf16.msra.mxu1 %v417_v4  ;;  %v421_v9 = vld [vmem:[%s555_s3 + $0x20] sm:$0xff]   ;;  %v424_v12 = vld [vmem:[%s555_s3 + $0x38] sm:$0xff]   ;;  %v426_v14 = vld [vmem:[%s556_s5 + $0x8] sm:$0xff]  }
   0x5   :  { %383 = vmatprep.subr.bf16.mxu1 %v433_v0  ;;  %v425_v13 = vld [vmem:[%s556_s5] sm:$0xff]   ;;  %v427_v23 = vld [vmem:[%s556_s5 + $0x10] sm:$0xff]   ;;  %v428_v24 = vld [vmem:[%s556_s5 + $0x18] sm:$0xff]  }
   0x6   :  { %v334_v15 = vld [vmem:[%s557_s2] ss:$0 sm:$0xff] }
   0x7   :  { %376 = vmatpush3.bf16.msra.mxu0 %v416_v2  ;;  %v338_v25 = vld [vmem:[%s558_s4] ss:$0 sm:$0xff] }
   0x8   :  { %401 = vmatprep.subr.bf16.mxu0 %v433_v0  ;;  %384 = vmatpush3.bf16.msra.mxu1 %v418_v6  ;;  %v347_v34 = vld [vmem:[%s560_s6] ss:$0 sm:$0xff] }
   0x9   :  { %385 = vmatprep.subr.bf16.mxu1 %v433_v0  ;;  %v353_v39 = vld [vmem:[%s561_s7] ss:$0 sm:$0xff] }
   0xa   :  { %378 = vmatmul.mubr.msk.bf16.vlgmr.msra.gmra.mrb[0].mxu0 %vm60_vm1, %v36_v5  ;;  %v354_v44 = vld [vmem:[#allocation2] ss:$0 sm:$0xff] }
   0xb   :  { %409 = vmatprep.mubr.msk.bf16.mxu0 %vm434_vm0, %v433_v0  ;;  %402 = vmatpush3.bf16.msra.mxu0 %v425_v13 }
   0xc   :  { %386 = vmatpush3.bf16.msra.mxu1 %v419_v7  ;;  %403 = vmatprep.subr.bf16.mxu0 %v433_v0 }
   0xd   :  { %387 = vmatprep.subr.bf16.mxu1 %v433_v0 }
   0xf   :  { %404 = vmatpush3.bf16.msra.mxu0 %v426_v14 }
  0x10   :  { %388 = vmatpush3.bf16.msra.mxu1 %v420_v8  ;;  %405 = vmatprep.subr.bf16.mxu0 %v433_v0 }
  0x11   :  { %389 = vmatprep.subr.bf16.mxu1 %v433_v0 }
  0x13   :  { %406 = vmatpush3.bf16.msra.mxu0 %v427_v23 }
  0x14   :  { %390 = vmatpush3.bf16.msra.mxu1 %v421_v9  ;;  %407 = vmatprep.subr.bf16.mxu0 %v433_v0 }
  0x15   :  { %391 = vmatprep.subr.bf16.mxu1 %v433_v0 }
  0x17   :  { %408 = vmatpush3.bf16.msra.mxu0 %v428_v24 }
  0x18   :  { %392 = vmatpush3.bf16.msra.mxu1 %v422_v10 }
  0x19   :  { %393 = vmatprep.subr.bf16.mxu1 %v433_v0 }
  0x1c   :  { %394 = vmatpush3.bf16.msra.mxu1 %v423_v11 }
  0x1d   :  { %395 = vmatprep.subr.bf16.mxu1 %v433_v0 }
  0x20   :  { %396 = vmatpush3.bf16.msra.mxu1 %v424_v12 }
  0xdd   :  { %v98_v16 = vpop.f32.mrb[0].mxu0 }
  0xde   :  { %v99_v17 = vadd.f32 %v334_v15, %v98_v16  ;;  %v379_v18 = vpop.f32.mrb[1].mxu0 }
  0xdf   :  { %v101_v19 = vpop.f32.mrb[2].mxu0 }
  0xe0   :  { %v104_v20 = vmax.f32 %v99_v17, 0.0  ;;  %v380_v21 = vpop.f32.mrb[3].mxu0 }
  0xe2   :  { %v105_v22 = vpack.c.bf16 %v104_v20, %v104_v20 }
  0xe4   :  { %398 = vmatmul.mubr.bf16.vlgmr.msra.gmra.mrb[0].mxu1 %v105_v22 }
 0x1b7   :  { %v211_v26 = vpop.f32.mrb[0].mxu1 }
 0x1b8   :  { %v212_v27 = vadd.f32 %v338_v25, %v211_v26  ;;  %v399_v28 = vpop.f32.mrb[1].mxu1 }
 0x1b9   :  { %v214_v29 = vpop.f32.mrb[2].mxu1 }
 0x1ba   :  { %v217_v30 = vmax.f32 %v212_v27, 0.0  ;;  %v400_v31 = vpop.f32.mrb[3].mxu1 }
 0x1bc   :  { %v218_v32 = vpack.c.bf16 %v217_v30, %v217_v30 }
 0x1be   :  { %410 = vmatmul.mubr.msk.bf16.vlgmr.msra.gmra.mrb[4].mxu0 %vm258_vm2, %v218_v32 }
 0x291   :  { %v296_v35 = vpop.f32.mrb[4].mxu0 }
 0x292   :  { %v297_v36 = vadd.f32 %v347_v34, %v296_v35  ;;  %v411_v37 = vpop.f32.mrb[5].mxu0 }
 0x293   :  { %v299_v38 = vpop.f32.mrb[6].mxu0 }
 0x294   :  { %v302_v40 = vmax.f32 %v297_v36, 0.0  ;;  %v412_v41 = vpop.f32.mrb[7].mxu0 }
 0x296   :  { %v310_v42 = vmul.f32 %v353_v39, %v302_v40 }
 0x298   :  { %v311_v43 = vsel %vm60_vm1, %v310_v42, 0.0 }
 0x299   :  { %312 = vadd.xlane.f32.xlu0 %v311_v43 }
 0x326   :  { %v313_v45 = vpop.xlane.xlu0 %312 }
 0x327   :  { %v321_v46 = vadd.f32 %v354_v44, %v313_v45 }
 0x329   :  { %v355_v47 = vmul.f32 -1.442695, %v321_v46 }
 0x32b   :  { %429 = vpow2.f32 %v355_v47 }
 0x335   :  { %v430_v48 = vpop.eup %429 }
 0x336   :  { %v325_v49 = vadd.f32 1.0, %v430_v48 }
 0x338   :  { %431 = vrcp.f32 %v325_v49 }
 0x342   :  { %v432_v50 = vpop.eup %431 }
 0x343   :  { %329 = vst.msk [vmem:[%s562_s9] sm:$0xff] %vm328_vm3, %v432_v50 }

</bundles_post_ra>
